<compile_context>
chip_gen: v5e
topology: v5e:2x2
jax: 0.10.0
libtpu: 0.0.40
codegen_flags: <defaults>
</compile_context>

<pallas_src>
import functools

import jax
import jax.numpy as jnp
from jax import lax
from jax.experimental import pallas as pl
from jax.experimental.pallas import tpu as pltpu


def _label_smoothing_kernel(x_ref, t_ref, loss_ref, *, n_rows, tile_rows,
                            padding_idx, fill, confidence, s_td):
    x = x_ref[...].astype(jnp.float32)                         # (TN, V)
    tgt = t_ref[...]                                            # (TN, 1) int32

    # Numerically stable log-sum-exp per row.
    m = jnp.max(x, axis=-1, keepdims=True)                      # (TN, 1)
    lse = jnp.log(jnp.sum(jnp.exp(x - m), axis=-1, keepdims=True))  # (TN, 1)

    # Single fused weighted reduction: coef == smoothed target distribution row.
    col = lax.broadcasted_iota(jnp.int32, x.shape, 1)
    coef = jnp.where(col == tgt, confidence, fill)
    coef = jnp.where(col == padding_idx, 0.0, coef)
    dot_td_x = jnp.sum(coef * x, axis=-1, keepdims=True)        # (TN, 1)

    loss = s_td * (m + lse) - dot_td_x                          # (TN, 1)

    # Mask: rows whose target is the padding index contribute zero loss, and
    # rows beyond N (ragged tail tile, read as garbage) are dropped here instead
    # of padding the logits in HBM.
    row_id = pl.program_id(0) * tile_rows + lax.broadcasted_iota(
        jnp.int32, (tile_rows, 1), 0)
    valid = jnp.logical_and(row_id < n_rows, tgt != padding_idx)
    loss_ref[...] = jnp.where(valid, loss, 0.0)


def _round_up(x, m):
    return ((int(x) + m - 1) // m) * m


def _vmem_capacity_bytes():
    try:
        return int(pltpu.get_tpu_info().vmem_capacity_bytes)
    except Exception:
        return 64 << 20      # conservative (v7x-sized) fallback


def _choose_tile_rows(n, v, itemsize, sublane, budget_bytes):
    """Row tile: as big as the VMEM budget allows (double-buffered native-dtype
    input block + ~4 f32 (TN,V) intermediates), rounded to the dtype sublane
    multiple, capped so there are >=2 tiles when possible (v7x megacore)."""
    bytes_per_row = v * (2 * itemsize + 16)
    by_budget = max(sublane, (budget_bytes // bytes_per_row) // sublane * sublane)
    n_round = _round_up(n, sublane)
    half = max(sublane, _round_up((n + 1) // 2, sublane))
    return int(max(sublane, min(by_budget, n_round, half, 8192)))


def label_smoothing_loss(x, target, *, size, padding_idx, smoothing=0.0,
                         tile_rows=None):
    """x: (N, size) float logits, target: (N,) int class indices. Returns scalar loss."""
    assert x.ndim == 2 and x.shape[1] == size
    assert size > 2, "size must be > 2 (fill = smoothing/(size-2))"
    assert 0 <= padding_idx < size, "padding_idx must be a valid (non-negative) class"
    N, V = x.shape
    confidence = 1.0 - smoothing
    fill = smoothing / (size - 2)
    s_td = confidence + fill * (size - 2)

    itemsize = int(jnp.dtype(x.dtype).itemsize)
    sublane = {4: 8, 2: 16, 1: 32}.get(itemsize, 8)

    # Generation-aware VMEM budgets (v5e/v6e: 128 MiB, v7x: 64 MiB physical).
    if _vmem_capacity_bytes() >= (100 << 20):
        budget, vmem_limit = 80 << 20, 100 << 20
    else:
        budget, vmem_limit = 36 << 20, 48 << 20

    if tile_rows is None:
        TN = _choose_tile_rows(N, V, itemsize, sublane, budget)
    else:
        TN = max(sublane, _round_up(tile_rows, sublane))

    num_tiles = pl.cdiv(N, TN)
    tgt2d = target.astype(jnp.int32).reshape(N, 1)

    kernel = functools.partial(
        _label_smoothing_kernel,
        n_rows=N, tile_rows=TN, padding_idx=padding_idx,
        fill=float(fill), confidence=float(confidence), s_td=float(s_td),
    )

    cost = pl.CostEstimate(
        flops=6 * N * V,                    # selects, mul-add reduce, sub, max
        transcendentals=N * V,              # exp
        bytes_accessed=N * V * itemsize + N * 4 + N * 4,
    )

    per_row = pl.pallas_call(
        kernel,
        out_shape=jax.ShapeDtypeStruct((N, 1), jnp.float32),
        grid_spec=pltpu.PrefetchScalarGridSpec(
            num_scalar_prefetch=0,
            grid=(num_tiles,),
            in_specs=[
                pl.BlockSpec((TN, V), lambda i: (i, 0)),
                pl.BlockSpec((TN, 1), lambda i: (i, 0)),
            ],
            out_specs=pl.BlockSpec((TN, 1), lambda i: (i, 0)),
        ),
        compiler_params=pltpu.CompilerParams(
            dimension_semantics=("parallel",),   # independent tiles -> v7x 2-TC sharding
            vmem_limit_bytes=vmem_limit,
        ),
        cost_estimate=cost,
    )(x, tgt2d)

    # CrossEntropyLoss(reduction='mean') with probability targets divides by batch size.
    return jnp.sum(per_row) / N


def _reference_loss(x, target, *, size, padding_idx, smoothing):
    confidence = 1.0 - smoothing
    N, V = x.shape
    col = jnp.arange(V)[None, :]
    tgt = target[:, None]
    td = jnp.where(col == tgt, confidence, smoothing / (size - 2))
    td = jnp.where(col == padding_idx, 0.0, td)
    td = jnp.where(tgt == padding_idx, 0.0, td)
    logp = jax.nn.log_softmax(x.astype(jnp.float32), axis=-1)
    return jnp.mean(-jnp.sum(td * logp, axis=-1))


if __name__ == "__main__":
    key = jax.random.PRNGKey(0)

    # --- Test 1: small, aligned shape (matches the original module usage scale) ---
    N, size = 8, 32
    padding_idx, smoothing = 0, 0.1
    kx, kt = jax.random.split(key)
    x = jax.random.normal(kx, (N, size), dtype=jnp.float32)
    target = jax.random.randint(kt, (N,), 0, size, dtype=jnp.int32)
    target = target.at[1].set(padding_idx).at[5].set(padding_idx)

    loss = jax.block_until_ready(
        label_smoothing_loss(x, target, size=size, padding_idx=padding_idx,
                             smoothing=smoothing))
    ref = _reference_loss(x, target, size=size, padding_idx=padding_idx,
                          smoothing=smoothing)
    assert jnp.allclose(loss, ref, rtol=1e-4, atol=1e-5), (loss, ref)

    # --- Test 2: ragged N, forced multi-tile grid (exercises the in-kernel
    #             tail-row masking that replaced the wrapper-side jnp.pad copy) ---
    N2, size2 = 200, 192
    padding_idx2, smoothing2 = 3, 0.2
    kx2, kt2 = jax.random.split(jax.random.PRNGKey(1))
    x2 = jax.random.normal(kx2, (N2, size2), dtype=jnp.float32)
    target2 = jax.random.randint(kt2, (N2,), 0, size2, dtype=jnp.int32)
    target2 = target2.at[7].set(padding_idx2).at[100].set(padding_idx2)

    loss2 = jax.block_until_ready(
        label_smoothing_loss(x2, target2, size=size2, padding_idx=padding_idx2,
                             smoothing=smoothing2, tile_rows=64))
    ref2 = _reference_loss(x2, target2, size=size2, padding_idx=padding_idx2,
                           smoothing=smoothing2)
    assert jnp.allclose(loss2, ref2, rtol=1e-4, atol=1e-5), (loss2, ref2)

    # --- Test 3: bf16 logits, ragged N (exercises dtype-aware sublane rounding;
    #             native-dtype HBM->VMEM block, f32 math inside the kernel) ---
    N3, size3 = 24, 128
    padding_idx3, smoothing3 = 1, 0.1
    kx3, kt3 = jax.random.split(jax.random.PRNGKey(2))
    x3 = jax.random.normal(kx3, (N3, size3), dtype=jnp.bfloat16)
    target3 = jax.random.randint(kt3, (N3,), 0, size3, dtype=jnp.int32)
    target3 = target3.at[0].set(padding_idx3)

    loss3 = jax.block_until_ready(
        label_smoothing_loss(x3, target3, size=size3, padding_idx=padding_idx3,
                             smoothing=smoothing3))
    ref3 = _reference_loss(x3, target3, size=size3, padding_idx=padding_idx3,
                           smoothing=smoothing3)
    assert jnp.allclose(loss3, ref3, rtol=1e-4, atol=1e-5), (loss3, ref3)

    print("KERNEL_OK")
</pallas_src>

<mosaic_0001>
module attributes {stable_mosaic.version = 11 : i64} {
  func.func @_label_smoothing_kernel(%arg0: i32, %arg1: memref<8x32xf32, #tpu.memory_space<vmem>>, %arg2: memref<8x1xi32, #tpu.memory_space<vmem>>, %arg3: memref<8x1xf32, #tpu.memory_space<vmem>>) attributes {dimension_semantics = [#tpu.dimension_semantics<parallel>], iteration_bounds = array<i64: 1>, scalar_prefetch = 0 : i64, scratch_operands = 0 : i64, tpu.core_type = #tpu.core_type<tc>, window_params = [{transform_indices = @transform_0, window_bounds = array<i64: 8, 32>}, {transform_indices = @transform_1, window_bounds = array<i64: 8, 1>}, {transform_indices = @transform_2, window_bounds = array<i64: 8, 1>}]} {
    %c0 = arith.constant 0 : index
    %c0_0 = arith.constant 0 : index
    %0 = vector.load %arg1[%c0, %c0_0] : memref<8x32xf32, #tpu.memory_space<vmem>>, vector<8x32xf32>
    %c0_1 = arith.constant 0 : index
    %c0_2 = arith.constant 0 : index
    %1 = vector.load %arg2[%c0_1, %c0_2] : memref<8x1xi32, #tpu.memory_space<vmem>>, vector<8x1xi32>
    %cst = arith.constant dense<0xFF800000> : vector<8xf32>
    %2 = vector.multi_reduction <maximumf>, %0, %cst [1] : vector<8x32xf32> to vector<8xf32>
    %3 = vector.shape_cast %2 : vector<8xf32> to vector<8x1xf32>
    %4 = vector.broadcast %3 : vector<8x1xf32> to vector<8x32xf32>
    %5 = arith.subf %0, %4 : vector<8x32xf32>
    %6 = math.exp %5 : vector<8x32xf32>
    %cst_3 = arith.constant dense<0.000000e+00> : vector<8xf32>
    %7 = vector.multi_reduction <add>, %6, %cst_3 [1] : vector<8x32xf32> to vector<8xf32>
    %8 = vector.shape_cast %7 : vector<8xf32> to vector<8x1xf32>
    %9 = math.log %8 : vector<8x1xf32>
    %10 = tpu.iota {dimensions = array<i32: 1>} : vector<8x32xi32>
    %11 = vector.broadcast %1 : vector<8x1xi32> to vector<8x32xi32>
    %12 = arith.cmpi eq, %10, %11 : vector<8x32xi32>
    %cst_4 = arith.constant 0.899999976 : f32
    %cst_5 = arith.constant 0.00333333341 : f32
    %13 = vector.broadcast %cst_4 : f32 to vector<8x32xf32>
    %14 = vector.broadcast %cst_5 : f32 to vector<8x32xf32>
    %15 = arith.select %12, %13, %14 : vector<8x32xi1>, vector<8x32xf32>
    %c0_i32 = arith.constant 0 : i32
    %16 = vector.broadcast %c0_i32 : i32 to vector<8x32xi32>
    %17 = arith.cmpi eq, %10, %16 : vector<8x32xi32>
    %cst_6 = arith.constant 0.000000e+00 : f32
    %18 = vector.broadcast %cst_6 : f32 to vector<8x32xf32>
    %19 = arith.select %17, %18, %15 : vector<8x32xi1>, vector<8x32xf32>
    %20 = arith.mulf %19, %0 : vector<8x32xf32>
    %cst_7 = arith.constant dense<0.000000e+00> : vector<8xf32>
    %21 = vector.multi_reduction <add>, %20, %cst_7 [1] : vector<8x32xf32> to vector<8xf32>
    %22 = vector.shape_cast %21 : vector<8xf32> to vector<8x1xf32>
    %23 = arith.addf %3, %9 : vector<8x1xf32>
    %cst_8 = arith.constant 1.000000e+00 : f32
    %24 = vector.broadcast %cst_8 : f32 to vector<8x1xf32>
    %25 = arith.mulf %24, %23 : vector<8x1xf32>
    %26 = arith.subf %25, %22 : vector<8x1xf32>
    %c8_i32 = arith.constant 8 : i32
    %27 = arith.muli %arg0, %c8_i32 : i32
    %28 = tpu.iota {dimensions = array<i32: 0>} : vector<8x1xi32>
    %29 = vector.broadcast %27 : i32 to vector<8x1xi32>
    %30 = arith.addi %29, %28 : vector<8x1xi32>
    %c8_i32_9 = arith.constant 8 : i32
    %31 = vector.broadcast %c8_i32_9 : i32 to vector<8x1xi32>
    %32 = arith.cmpi slt, %30, %31 : vector<8x1xi32>
    %c0_i32_10 = arith.constant 0 : i32
    %33 = vector.broadcast %c0_i32_10 : i32 to vector<8x1xi32>
    %34 = arith.cmpi ne, %1, %33 : vector<8x1xi32>
    %35 = arith.andi %32, %34 : vector<8x1xi1>
    %cst_11 = arith.constant 0.000000e+00 : f32
    %36 = vector.broadcast %cst_11 : f32 to vector<8x1xf32>
    %37 = arith.select %35, %26, %36 : vector<8x1xi1>, vector<8x1xf32>
    %c0_12 = arith.constant 0 : index
    %c0_13 = arith.constant 0 : index
    %38 = vector.load %arg3[%c0_12, %c0_13] : memref<8x1xf32, #tpu.memory_space<vmem>>, vector<8x1xf32>
    tpu.vector_store %arg3[%c0_12, %c0_13], %37 {strides = array<i32>} : memref<8x1xf32, #tpu.memory_space<vmem>>, vector<8x1xf32>,
    return
  }
  func.func @transform_0(%arg0: i32) -> (i32, i32) {
    %c0_i32 = arith.constant 0 : i32
    %c0_i32_0 = arith.constant 0 : i32
    return %arg0, %c0_i32 : i32, i32
  }
  func.func @transform_1(%arg0: i32) -> (i32, i32) {
    %c0_i32 = arith.constant 0 : i32
    %c0_i32_0 = arith.constant 0 : i32
    return %arg0, %c0_i32 : i32, i32
  }
  func.func @transform_2(%arg0: i32) -> (i32, i32) {
    %c0_i32 = arith.constant 0 : i32
    %c0_i32_0 = arith.constant 0 : i32
    return %arg0, %c0_i32 : i32, i32
  }
}

</mosaic_0001>

<bundles_post_ra>
// kernel: tpu_custom_call.1
= control target key start
LH: loop header
LB: loop body
LE: loop exit
PB: predicated region body
PF: predicated region fallthrough
CT: control target
= control target key end

     0   :  { %vm13_vm0 = vcmask 261120   ;;  %v62_v1 = vmov 0   ;;  %v25_v8 = vlaneseq  ;;  %v63_v12 = vmov 0.0033333334   ;;  %s91_s0 = inlined_call_operand.vmem [shape: f32[8,32], index: 0, kind: input, shape index: {}]   ;;  %s92_s1 = inlined_call_operand.vmem [shape: s32[8,1], index: 1, kind: input, shape index: {}]   ;;  %s93_s2 = inlined_call_operand.vmem [shape: f32[8,1], index: 2, kind: output, shape index: {}]  }
   0x1   :  { %v11_v0 = vld [vmem:[%s91_s0] sm:$0xff]  ;;  %57 = vset.pattern.permute.xlu0 %v62_v1  ;;  %vm49_vm4 = vcmask 7168  }
   0x2   :  { %v14_v2 = vsel %vm13_vm0, %v11_v0, -inf  ;;  %v12_v3 = vld [vmem:[%s92_s1] sm:$0xff]  ;;  %v26_v10 = vand.u32 127, %v25_v8 }
   0x3   :  { %15 = vmax.xlane.f32.xlu0 %v14_v2  ;;  %vm46_vm3 = vcmp.ne.s32.totalorder %v12_v3, 0 }
   0x4   :  { %vm32_vm1 = vcmp.eq.s32.totalorder %v26_v10, 0 }
  0x17   :  { %28 = vperm.xlu0 %57, %v12_v3  }
  0x76   :  { %v16_v4 = vpop.xlane.xlu0 %15 }
  0x77   :  { %v17_v5 = vsub.f32 %v11_v0, %v16_v4 }
  0x79   :  { %v18_v6 = vmul.f32 1.442695, %v17_v5 }
  0x7b   :  { %58 = vpow2.f32 %v18_v6 }
  0x81   :  { %v59_v7 = vpop.eup %58 }
  0x82   :  { %v20_v9 = vsel %vm13_vm0, %v59_v7, 0.0 }
  0x83   :  { %21 = vadd.xlane.f32.xlu1 %v20_v9 }
  0x89   :  { %v29_v11 = vpop.permute.xlu0 %28 }
  0x8a   :  { %vm30_vm2 = vcmp.eq.s32.totalorder %v26_v10, %v29_v11 }
  0x8b   :  { %v31_v13 = vsel %vm30_vm2, 0.9, %v63_v12 }
  0x8c   :  { %v33_v14 = vsel %vm32_vm1, 0.0, %v31_v13 }
  0x8d   :  { %v34_v15 = vmul.f32 %v33_v14, %v11_v0 }
  0x8f   :  { %v35_v16 = vsel %vm13_vm0, %v34_v15, 0.0 }
  0x90   :  { %36 = vadd.xlane.f32.xlu1 %v35_v16 }
  0xf6   :  { %v22_v17 = vpop.xlane.xlu1 %21 }
  0xf7   :  { %60 = vlog2.f32 %v22_v17 }
  0xfd   :  { %v61_v18 = vpop.eup %60 }
  0xfe   :  { %v24_v19 = vmul.f32 0.6931472, %v61_v18 }
 0x100   :  { %v38_v20 = vadd.f32 %v24_v19, %v16_v4 }
 0x103   :  { %v37_v21 = vpop.xlane.xlu1 %36 }
 0x104   :  { %v39_v22 = vsub.f32 %v38_v20, %v37_v21 }
 0x106   :  { %v48_v23 = vsel %vm46_vm3, %v39_v22, 0.0 }
 0x107   :  { %50 = vst.msk [vmem:[%s93_s2] sm:$0xff] %vm49_vm4, %v48_v23 }

</bundles_post_ra>
